<compile_context>
chip_gen: v5e
topology: v5e:2x2
jax: 0.10.0
libtpu: 0.0.40
codegen_flags: <defaults>
</compile_context>

<pallas_src>
import jax
import jax.numpy as jnp
from jax.experimental import pallas as pl
from jax.experimental.pallas import tpu as pltpu


def _round_up(x, m):
    return ((x + m - 1) // m) * m


# ----------------------------------------------------------------------------
# Fused DCN kernel
# ----------------------------------------------------------------------------
def _make_fused_dcn_kernel(n_logit, n_dnn, sparse_cols, vocab_sizes, cross_num):
    n_sparse = len(sparse_cols)

    def kernel(*refs):
        idx = 0
        x_ref = refs[idx]; idx += 1
        logit_wb = []
        for _ in range(n_logit):
            logit_wb.append((refs[idx], refs[idx + 1])); idx += 2
        dnn_wb = []
        for _ in range(n_dnn):
            dnn_wb.append((refs[idx], refs[idx + 1])); idx += 2
        sel_dense_ref = refs[idx]; idx += 1
        emb_refs = [refs[idx + t] for t in range(n_sparse)]; idx += n_sparse
        ckT_ref = refs[idx]; idx += 1
        cb_ref = refs[idx]; idx += 1
        wfc_ref = refs[idx]; idx += 1
        wfd_ref = refs[idx]; idx += 1
        o_ref = refs[idx]

        x = x_ref[...]                                   # [TB, F] f32
        tb = x.shape[0]

        # ---- logit MLP over raw features (ReLU after EVERY layer, per spec) ----
        h = x
        for w_ref, b_ref in logit_wb:
            h = jnp.maximum(
                jnp.dot(h, w_ref[...], preferred_element_type=jnp.float32)
                + b_ref[...], 0.0)                       # -> [TB, 1]

        # ---- dnn_input = [dense cols | emb_0 | emb_1 | ...]  (all on MXU) ----
        # dense columns routed to their target positions via a selection matmul
        dnn_in = jnp.dot(x, sel_dense_ref[...],
                         preferred_element_type=jnp.float32)   # [TB, D]
        # sparse embeddings: one-hot @ zero-padded table (table already placed
        # at its target column range of D, so results just add up)
        for t in range(n_sparse):
            col = sparse_cols[t]
            ids = x[:, col:col + 1].astype(jnp.int32)           # [TB, 1]
            iota = jax.lax.broadcasted_iota(
                jnp.int32, (tb, vocab_sizes[t]), 1)             # [TB, V_t]
            onehot = (iota == ids).astype(jnp.float32)
            dnn_in = dnn_in + jnp.dot(onehot, emb_refs[t][...],
                                      preferred_element_type=jnp.float32)

        # ---- DNN tower ----
        d = dnn_in
        for w_ref, b_ref in dnn_wb:
            d = jnp.maximum(
                jnp.dot(d, w_ref[...], preferred_element_type=jnp.float32)
                + b_ref[...], 0.0)                       # -> [TB, H_last]

        # ---- CrossNet ('vector'): x_{l+1} = x0 * (x_l . k_l) + b_l + x_l ----
        ckT = ckT_ref[...]                               # [D, L]
        cb = cb_ref[...]                                 # [L, D]
        x0 = dnn_in
        x1 = x0
        for i in range(cross_num):
            s = jnp.dot(x1, ckT[:, i:i + 1],
                        preferred_element_type=jnp.float32)     # [TB, 1] (MXU)
            x1 = x0 * s + cb[i:i + 1, :] + x1

        # ---- final: sigmoid(logit + [cross, deep] @ w_final), split matvec ----
        z = h \
            + jnp.dot(x1, wfc_ref[...], preferred_element_type=jnp.float32) \
            + jnp.dot(d, wfd_ref[...], preferred_element_type=jnp.float32)
        o_ref[...] = jax.nn.sigmoid(z)

    return kernel


# ----------------------------------------------------------------------------
# Forward wrapper (parameter plumbing only; all math runs in the fused kernel)
# ----------------------------------------------------------------------------
def dcn_forward(X, params, sparse_names, dense_names, feature_idx, *, tile_b=None):
    B, F = X.shape
    n_sparse = len(sparse_names)
    n_dense = len(dense_names)
    emb_size = params["emb"][sparse_names[0]].shape[1]
    D = n_dense + emb_size * n_sparse
    cross_num = params["cross_bias"].shape[0]

    # --- batch tiling (pad to a multiple of the tile) ---
    if tile_b is None:
        tile_b = min(512, _round_up(B, 8))
    B_pad = _round_up(B, tile_b)
    if B_pad != B:
        X = jnp.pad(X, ((0, B_pad - B), (0, 0)))

    # --- derived, kernel-friendly parameter tensors (tiny, host/JAX side) ---
    # selection matrix routing dense feature columns into dnn_input[:, :n_dense]
    sel_dense = jnp.zeros((F, D), jnp.float32)
    for k, name in enumerate(dense_names):
        sel_dense = sel_dense.at[feature_idx[name], k].set(1.0)
    # zero-padded embedding tables placed at their dnn_input column ranges
    emb_pads = []
    for t, name in enumerate(sparse_names):
        tbl = params["emb"][name]
        pad = jnp.zeros((tbl.shape[0], D), jnp.float32)
        start = n_dense + t * emb_size
        pad = pad.at[:, start:start + emb_size].set(tbl)
        emb_pads.append(pad)
    ckT = params["cross_kernels"].T                         # [D, L]
    cb = params["cross_bias"]                               # [L, D]
    wf = params["w_final"]                                  # [D + H_last, 1]
    wfc, wfd = wf[:D, :], wf[D:, :]

    # --- assemble inputs + specs ---
    inputs = [X]
    in_specs = [pl.BlockSpec((tile_b, F), lambda i: (i, 0))]

    def add_resident(arr):
        arr = jnp.asarray(arr, jnp.float32)
        inputs.append(arr)
        # constant index_map -> stays VMEM-resident across batch tiles
        in_specs.append(pl.BlockSpec(arr.shape, lambda i, _nd=arr.ndim: (0,) * _nd))

    for w, b in params["logit_layers"]:
        add_resident(w); add_resident(b)
    for w, b in params["dnn_layers"]:
        add_resident(w); add_resident(b)
    add_resident(sel_dense)
    for pad in emb_pads:
        add_resident(pad)
    add_resident(ckT)
    add_resident(cb)
    add_resident(wfc)
    add_resident(wfd)

    kernel = _make_fused_dcn_kernel(
        n_logit=len(params["logit_layers"]),
        n_dnn=len(params["dnn_layers"]),
        sparse_cols=[feature_idx[n] for n in sparse_names],
        vocab_sizes=[params["emb"][n].shape[0] for n in sparse_names],
        cross_num=cross_num,
    )

    out = pl.pallas_call(
        kernel,
        out_shape=jax.ShapeDtypeStruct((B_pad, 1), jnp.float32),
        grid=(B_pad // tile_b,),
        in_specs=in_specs,
        out_specs=pl.BlockSpec((tile_b, 1), lambda i: (i, 0)),
        compiler_params=pltpu.CompilerParams(
            dimension_semantics=("parallel",),          # both TCs on v7x
            vmem_limit_bytes=32 * 1024 * 1024,
        ),
    )(*inputs)
    return out[:B]


# ----------------------------------------------------------------------------
# Deterministic parameter construction + example run
# ----------------------------------------------------------------------------
def build_params(key, n_feats, emb_size, vocab_sizes, sparse_names,
                 inputs_dim, dnn_hidden_units, cross_num):
    keys = iter(jax.random.split(key, 64))
    params = {}

    def normal(shape, std=0.1):
        return (std * jax.random.normal(next(keys), shape)).astype(jnp.float32)

    # logit MLP: [n_feats] + hidden + [1], weights [in, out], bias [1, out]
    dims = [n_feats] + list(dnn_hidden_units) + [1]
    params["logit_layers"] = [
        (normal((dims[i], dims[i + 1])), jnp.zeros((1, dims[i + 1]), jnp.float32))
        for i in range(len(dims) - 1)
    ]

    # DNN tower: [inputs_dim] + hidden
    ddims = [inputs_dim] + list(dnn_hidden_units)
    params["dnn_layers"] = [
        (normal((ddims[i], ddims[i + 1])), jnp.zeros((1, ddims[i + 1]), jnp.float32))
        for i in range(len(ddims) - 1)
    ]

    # CrossNet ('vector'): kernels [L, D] (squeezed from [L, D, 1]), bias zeros
    xavier_std = (2.0 / (inputs_dim + 1.0)) ** 0.5
    params["cross_kernels"] = normal((cross_num, inputs_dim), std=xavier_std)
    params["cross_bias"] = jnp.zeros((cross_num, inputs_dim), jnp.float32)

    # final linear (no bias): [D + H_last, 1]
    params["w_final"] = normal((inputs_dim + dnn_hidden_units[-1], 1))

    # embedding tables
    params["emb"] = {
        name: normal((vocab_sizes[name], emb_size), std=1.0)
        for name in sparse_names
    }
    return params


if __name__ == "__main__":
    # Small synthetic feature config (3 sparse + 2 dense features).
    feat_size = {"C1": 10, "C2": 12, "C3": 8, "D1": 1, "D2": 1}
    sparse_names = ["C1", "C2", "C3"]
    dense_names = ["D1", "D2"]
    feature_idx = {name: i for i, name in enumerate(feat_size)}

    batch = 32
    emb_size = 4
    dnn_hidden_units = (32, 16)
    cross_num = 2
    n_feats = len(feat_size)
    inputs_dim = len(dense_names) + emb_size * len(sparse_names)   # 14

    key = jax.random.PRNGKey(0)
    k_x, k_ids, k_params = jax.random.split(key, 3)

    # Build input X: [batch, n_feats]; sparse columns hold integer-valued floats.
    dense_vals = jax.random.normal(k_x, (batch, len(dense_names))).astype(jnp.float32)
    id_keys = jax.random.split(k_ids, len(sparse_names))
    sparse_cols = [
        jax.random.randint(id_keys[i], (batch,), 0, feat_size[name]).astype(jnp.float32)
        for i, name in enumerate(sparse_names)
    ]
    X = jnp.zeros((batch, n_feats), jnp.float32)
    for i, name in enumerate(sparse_names):
        X = X.at[:, feature_idx[name]].set(sparse_cols[i])
    for i, name in enumerate(dense_names):
        X = X.at[:, feature_idx[name]].set(dense_vals[:, i])

    params = build_params(k_params, n_feats, emb_size, feat_size, sparse_names,
                          inputs_dim, dnn_hidden_units, cross_num)

    # tile_b=16 -> grid of 2 batch tiles, exercising the parallel batch axis.
    y_pred = dcn_forward(X, params, sparse_names, dense_names, feature_idx,
                         tile_b=16)
    y_pred = jax.block_until_ready(y_pred)
    assert y_pred.shape == (batch, 1)
    assert bool(jnp.all(jnp.isfinite(y_pred)))
    assert bool(jnp.all((y_pred >= 0.0) & (y_pred <= 1.0)))
    print("KERNEL_OK")
</pallas_src>

<mosaic_0001>
module attributes {stable_mosaic.version = 11 : i64} {
  func.func @kernel(%arg0: i32, %arg1: memref<16x5xf32, #tpu.memory_space<vmem>>, %arg2: memref<5x32xf32, #tpu.memory_space<vmem>>, %arg3: memref<1x32xf32, #tpu.memory_space<vmem>>, %arg4: memref<32x16xf32, #tpu.memory_space<vmem>>, %arg5: memref<1x16xf32, #tpu.memory_space<vmem>>, %arg6: memref<16x1xf32, #tpu.memory_space<vmem>>, %arg7: memref<1x1xf32, #tpu.memory_space<vmem>>, %arg8: memref<14x32xf32, #tpu.memory_space<vmem>>, %arg9: memref<1x32xf32, #tpu.memory_space<vmem>>, %arg10: memref<32x16xf32, #tpu.memory_space<vmem>>, %arg11: memref<1x16xf32, #tpu.memory_space<vmem>>, %arg12: memref<5x14xf32, #tpu.memory_space<vmem>>, %arg13: memref<10x14xf32, #tpu.memory_space<vmem>>, %arg14: memref<12x14xf32, #tpu.memory_space<vmem>>, %arg15: memref<8x14xf32, #tpu.memory_space<vmem>>, %arg16: memref<14x2xf32, #tpu.memory_space<vmem>>, %arg17: memref<2x14xf32, #tpu.memory_space<vmem>>, %arg18: memref<14x1xf32, #tpu.memory_space<vmem>>, %arg19: memref<16x1xf32, #tpu.memory_space<vmem>>, %arg20: memref<16x1xf32, #tpu.memory_space<vmem>>) attributes {dimension_semantics = [#tpu.dimension_semantics<parallel>], iteration_bounds = array<i64: 2>, scalar_prefetch = 0 : i64, scratch_operands = 0 : i64, tpu.core_type = #tpu.core_type<tc>, window_params = [{transform_indices = @transform_0, window_bounds = array<i64: 16, 5>}, {pipeline_mode = #tpu.pipeline_mode<synchronous>, transform_indices = @transform_1, window_bounds = array<i64: 5, 32>}, {pipeline_mode = #tpu.pipeline_mode<synchronous>, transform_indices = @transform_2, window_bounds = array<i64: 1, 32>}, {pipeline_mode = #tpu.pipeline_mode<synchronous>, transform_indices = @transform_3, window_bounds = array<i64: 32, 16>}, {pipeline_mode = #tpu.pipeline_mode<synchronous>, transform_indices = @transform_4, window_bounds = array<i64: 1, 16>}, {pipeline_mode = #tpu.pipeline_mode<synchronous>, transform_indices = @transform_5, window_bounds = array<i64: 16, 1>}, {pipeline_mode = #tpu.pipeline_mode<synchronous>, transform_indices = @transform_6, window_bounds = array<i64: 1, 1>}, {pipeline_mode = #tpu.pipeline_mode<synchronous>, transform_indices = @transform_7, window_bounds = array<i64: 14, 32>}, {pipeline_mode = #tpu.pipeline_mode<synchronous>, transform_indices = @transform_8, window_bounds = array<i64: 1, 32>}, {pipeline_mode = #tpu.pipeline_mode<synchronous>, transform_indices = @transform_9, window_bounds = array<i64: 32, 16>}, {pipeline_mode = #tpu.pipeline_mode<synchronous>, transform_indices = @transform_10, window_bounds = array<i64: 1, 16>}, {pipeline_mode = #tpu.pipeline_mode<synchronous>, transform_indices = @transform_11, window_bounds = array<i64: 5, 14>}, {pipeline_mode = #tpu.pipeline_mode<synchronous>, transform_indices = @transform_12, window_bounds = array<i64: 10, 14>}, {pipeline_mode = #tpu.pipeline_mode<synchronous>, transform_indices = @transform_13, window_bounds = array<i64: 12, 14>}, {pipeline_mode = #tpu.pipeline_mode<synchronous>, transform_indices = @transform_14, window_bounds = array<i64: 8, 14>}, {pipeline_mode = #tpu.pipeline_mode<synchronous>, transform_indices = @transform_15, window_bounds = array<i64: 14, 2>}, {pipeline_mode = #tpu.pipeline_mode<synchronous>, transform_indices = @transform_16, window_bounds = array<i64: 2, 14>}, {pipeline_mode = #tpu.pipeline_mode<synchronous>, transform_indices = @transform_17, window_bounds = array<i64: 14, 1>}, {pipeline_mode = #tpu.pipeline_mode<synchronous>, transform_indices = @transform_18, window_bounds = array<i64: 16, 1>}, {transform_indices = @transform_19, window_bounds = array<i64: 16, 1>}]} {
    %c0 = arith.constant 0 : index
    %c0_0 = arith.constant 0 : index
    %0 = vector.load %arg1[%c0, %c0_0] : memref<16x5xf32, #tpu.memory_space<vmem>>, vector<16x5xf32>
    %c0_1 = arith.constant 0 : index
    %c0_2 = arith.constant 0 : index
    %1 = vector.load %arg2[%c0_1, %c0_2] : memref<5x32xf32, #tpu.memory_space<vmem>>, vector<5x32xf32>
    %cst = arith.constant dense<0.000000e+00> : vector<16x32xf32>
    %2 = tpu.matmul %0, %1, %cst {dimension_numbers = #tpu.dot_dimension_numbers<[1], [0], [0], [1], [0, 0, 1, 1], [], []>} : vector<16x5xf32>, vector<5x32xf32>, vector<16x32xf32> -> vector<16x32xf32>
    %c0_3 = arith.constant 0 : index
    %c0_4 = arith.constant 0 : index
    %3 = vector.load %arg3[%c0_3, %c0_4] : memref<1x32xf32, #tpu.memory_space<vmem>>, vector<1x32xf32>
    %4 = vector.broadcast %3 : vector<1x32xf32> to vector<16x32xf32>
    %5 = arith.addf %2, %4 : vector<16x32xf32>
    %cst_5 = arith.constant 0.000000e+00 : f32
    %6 = vector.broadcast %cst_5 : f32 to vector<16x32xf32>
    %7 = arith.maximumf %5, %6 : vector<16x32xf32>
    %c0_6 = arith.constant 0 : index
    %c0_7 = arith.constant 0 : index
    %8 = vector.load %arg4[%c0_6, %c0_7] : memref<32x16xf32, #tpu.memory_space<vmem>>, vector<32x16xf32>
    %cst_8 = arith.constant dense<0.000000e+00> : vector<16x16xf32>
    %9 = tpu.matmul %7, %8, %cst_8 {dimension_numbers = #tpu.dot_dimension_numbers<[1], [0], [0], [1], [0, 0, 1, 1], [], []>} : vector<16x32xf32>, vector<32x16xf32>, vector<16x16xf32> -> vector<16x16xf32>
    %c0_9 = arith.constant 0 : index
    %c0_10 = arith.constant 0 : index
    %10 = vector.load %arg5[%c0_9, %c0_10] : memref<1x16xf32, #tpu.memory_space<vmem>>, vector<1x16xf32>
    %11 = vector.broadcast %10 : vector<1x16xf32> to vector<16x16xf32>
    %12 = arith.addf %9, %11 : vector<16x16xf32>
    %cst_11 = arith.constant 0.000000e+00 : f32
    %13 = vector.broadcast %cst_11 : f32 to vector<16x16xf32>
    %14 = arith.maximumf %12, %13 : vector<16x16xf32>
    %c0_12 = arith.constant 0 : index
    %c0_13 = arith.constant 0 : index
    %15 = vector.load %arg6[%c0_12, %c0_13] : memref<16x1xf32, #tpu.memory_space<vmem>>, vector<16x1xf32>
    %cst_14 = arith.constant dense<0.000000e+00> : vector<16x1xf32>
    %16 = tpu.matmul %14, %15, %cst_14 {dimension_numbers = #tpu.dot_dimension_numbers<[1], [0], [0], [1], [0, 0, 1, 1], [], []>} : vector<16x16xf32>, vector<16x1xf32>, vector<16x1xf32> -> vector<16x1xf32>
    %c0_15 = arith.constant 0 : index
    %c0_16 = arith.constant 0 : index
    %17 = vector.load %arg7[%c0_15, %c0_16] : memref<1x1xf32, #tpu.memory_space<vmem>>, vector<1x1xf32>
    %18 = vector.broadcast %17 : vector<1x1xf32> to vector<16x1xf32>
    %19 = arith.addf %16, %18 : vector<16x1xf32>
    %cst_17 = arith.constant 0.000000e+00 : f32
    %20 = vector.broadcast %cst_17 : f32 to vector<16x1xf32>
    %21 = arith.maximumf %19, %20 : vector<16x1xf32>
    %c0_18 = arith.constant 0 : index
    %c0_19 = arith.constant 0 : index
    %22 = vector.load %arg12[%c0_18, %c0_19] : memref<5x14xf32, #tpu.memory_space<vmem>>, vector<5x14xf32>
    %cst_20 = arith.constant dense<0.000000e+00> : vector<16x14xf32>
    %23 = tpu.matmul %0, %22, %cst_20 {dimension_numbers = #tpu.dot_dimension_numbers<[1], [0], [0], [1], [0, 0, 1, 1], [], []>} : vector<16x5xf32>, vector<5x14xf32>, vector<16x14xf32> -> vector<16x14xf32>
    %24 = vector.extract_strided_slice %0 {offsets = [0, 0], sizes = [16, 1], strides = [1, 1]} : vector<16x5xf32> to vector<16x1xf32>
    %25 = arith.fptosi %24 : vector<16x1xf32> to vector<16x1xi32>
    %26 = tpu.iota {dimensions = array<i32: 1>} : vector<16x10xi32>
    %27 = vector.broadcast %25 : vector<16x1xi32> to vector<16x10xi32>
    %28 = arith.cmpi eq, %26, %27 : vector<16x10xi32>
    %29 = arith.extui %28 : vector<16x10xi1> to vector<16x10xi32>
    %30 = arith.sitofp %29 : vector<16x10xi32> to vector<16x10xf32>
    %c0_21 = arith.constant 0 : index
    %c0_22 = arith.constant 0 : index
    %31 = vector.load %arg13[%c0_21, %c0_22] : memref<10x14xf32, #tpu.memory_space<vmem>>, vector<10x14xf32>
    %cst_23 = arith.constant dense<0.000000e+00> : vector<16x14xf32>
    %32 = tpu.matmul %30, %31, %cst_23 {dimension_numbers = #tpu.dot_dimension_numbers<[1], [0], [0], [1], [0, 0, 1, 1], [], []>} : vector<16x10xf32>, vector<10x14xf32>, vector<16x14xf32> -> vector<16x14xf32>
    %33 = arith.addf %23, %32 : vector<16x14xf32>
    %34 = vector.extract_strided_slice %0 {offsets = [0, 1], sizes = [16, 1], strides = [1, 1]} : vector<16x5xf32> to vector<16x1xf32>
    %35 = arith.fptosi %34 : vector<16x1xf32> to vector<16x1xi32>
    %36 = tpu.iota {dimensions = array<i32: 1>} : vector<16x12xi32>
    %37 = vector.broadcast %35 : vector<16x1xi32> to vector<16x12xi32>
    %38 = arith.cmpi eq, %36, %37 : vector<16x12xi32>
    %39 = arith.extui %38 : vector<16x12xi1> to vector<16x12xi32>
    %40 = arith.sitofp %39 : vector<16x12xi32> to vector<16x12xf32>
    %c0_24 = arith.constant 0 : index
    %c0_25 = arith.constant 0 : index
    %41 = vector.load %arg14[%c0_24, %c0_25] : memref<12x14xf32, #tpu.memory_space<vmem>>, vector<12x14xf32>
    %cst_26 = arith.constant dense<0.000000e+00> : vector<16x14xf32>
    %42 = tpu.matmul %40, %41, %cst_26 {dimension_numbers = #tpu.dot_dimension_numbers<[1], [0], [0], [1], [0, 0, 1, 1], [], []>} : vector<16x12xf32>, vector<12x14xf32>, vector<16x14xf32> -> vector<16x14xf32>
    %43 = arith.addf %33, %42 : vector<16x14xf32>
    %44 = vector.extract_strided_slice %0 {offsets = [0, 2], sizes = [16, 1], strides = [1, 1]} : vector<16x5xf32> to vector<16x1xf32>
    %45 = arith.fptosi %44 : vector<16x1xf32> to vector<16x1xi32>
    %46 = tpu.iota {dimensions = array<i32: 1>} : vector<16x8xi32>
    %47 = vector.broadcast %45 : vector<16x1xi32> to vector<16x8xi32>
    %48 = arith.cmpi eq, %46, %47 : vector<16x8xi32>
    %49 = arith.extui %48 : vector<16x8xi1> to vector<16x8xi32>
    %50 = arith.sitofp %49 : vector<16x8xi32> to vector<16x8xf32>
    %c0_27 = arith.constant 0 : index
    %c0_28 = arith.constant 0 : index
    %51 = vector.load %arg15[%c0_27, %c0_28] : memref<8x14xf32, #tpu.memory_space<vmem>>, vector<8x14xf32>
    %cst_29 = arith.constant dense<0.000000e+00> : vector<16x14xf32>
    %52 = tpu.matmul %50, %51, %cst_29 {dimension_numbers = #tpu.dot_dimension_numbers<[1], [0], [0], [1], [0, 0, 1, 1], [], []>} : vector<16x8xf32>, vector<8x14xf32>, vector<16x14xf32> -> vector<16x14xf32>
    %53 = arith.addf %43, %52 : vector<16x14xf32>
    %c0_30 = arith.constant 0 : index
    %c0_31 = arith.constant 0 : index
    %54 = vector.load %arg8[%c0_30, %c0_31] : memref<14x32xf32, #tpu.memory_space<vmem>>, vector<14x32xf32>
    %cst_32 = arith.constant dense<0.000000e+00> : vector<16x32xf32>
    %55 = tpu.matmul %53, %54, %cst_32 {dimension_numbers = #tpu.dot_dimension_numbers<[1], [0], [0], [1], [0, 0, 1, 1], [], []>} : vector<16x14xf32>, vector<14x32xf32>, vector<16x32xf32> -> vector<16x32xf32>
    %c0_33 = arith.constant 0 : index
    %c0_34 = arith.constant 0 : index
    %56 = vector.load %arg9[%c0_33, %c0_34] : memref<1x32xf32, #tpu.memory_space<vmem>>, vector<1x32xf32>
    %57 = vector.broadcast %56 : vector<1x32xf32> to vector<16x32xf32>
    %58 = arith.addf %55, %57 : vector<16x32xf32>
    %cst_35 = arith.constant 0.000000e+00 : f32
    %59 = vector.broadcast %cst_35 : f32 to vector<16x32xf32>
    %60 = arith.maximumf %58, %59 : vector<16x32xf32>
    %c0_36 = arith.constant 0 : index
    %c0_37 = arith.constant 0 : index
    %61 = vector.load %arg10[%c0_36, %c0_37] : memref<32x16xf32, #tpu.memory_space<vmem>>, vector<32x16xf32>
    %cst_38 = arith.constant dense<0.000000e+00> : vector<16x16xf32>
    %62 = tpu.matmul %60, %61, %cst_38 {dimension_numbers = #tpu.dot_dimension_numbers<[1], [0], [0], [1], [0, 0, 1, 1], [], []>} : vector<16x32xf32>, vector<32x16xf32>, vector<16x16xf32> -> vector<16x16xf32>
    %c0_39 = arith.constant 0 : index
    %c0_40 = arith.constant 0 : index
    %63 = vector.load %arg11[%c0_39, %c0_40] : memref<1x16xf32, #tpu.memory_space<vmem>>, vector<1x16xf32>
    %64 = vector.broadcast %63 : vector<1x16xf32> to vector<16x16xf32>
    %65 = arith.addf %62, %64 : vector<16x16xf32>
    %cst_41 = arith.constant 0.000000e+00 : f32
    %66 = vector.broadcast %cst_41 : f32 to vector<16x16xf32>
    %67 = arith.maximumf %65, %66 : vector<16x16xf32>
    %c0_42 = arith.constant 0 : index
    %c0_43 = arith.constant 0 : index
    %68 = vector.load %arg16[%c0_42, %c0_43] : memref<14x2xf32, #tpu.memory_space<vmem>>, vector<14x2xf32>
    %c0_44 = arith.constant 0 : index
    %c0_45 = arith.constant 0 : index
    %69 = vector.load %arg17[%c0_44, %c0_45] : memref<2x14xf32, #tpu.memory_space<vmem>>, vector<2x14xf32>
    %70 = vector.extract_strided_slice %68 {offsets = [0, 0], sizes = [14, 1], strides = [1, 1]} : vector<14x2xf32> to vector<14x1xf32>
    %cst_46 = arith.constant dense<0.000000e+00> : vector<16x1xf32>
    %71 = tpu.matmul %53, %70, %cst_46 {dimension_numbers = #tpu.dot_dimension_numbers<[1], [0], [0], [1], [0, 0, 1, 1], [], []>} : vector<16x14xf32>, vector<14x1xf32>, vector<16x1xf32> -> vector<16x1xf32>
    %72 = vector.broadcast %71 : vector<16x1xf32> to vector<16x14xf32>
    %73 = arith.mulf %53, %72 : vector<16x14xf32>
    %74 = vector.extract_strided_slice %69 {offsets = [0, 0], sizes = [1, 14], strides = [1, 1]} : vector<2x14xf32> to vector<1x14xf32>
    %75 = vector.broadcast %74 : vector<1x14xf32> to vector<16x14xf32>
    %76 = arith.addf %73, %75 : vector<16x14xf32>
    %77 = arith.addf %76, %53 : vector<16x14xf32>
    %78 = vector.extract_strided_slice %68 {offsets = [0, 1], sizes = [14, 1], strides = [1, 1]} : vector<14x2xf32> to vector<14x1xf32>
    %cst_47 = arith.constant dense<0.000000e+00> : vector<16x1xf32>
    %79 = tpu.matmul %77, %78, %cst_47 {dimension_numbers = #tpu.dot_dimension_numbers<[1], [0], [0], [1], [0, 0, 1, 1], [], []>} : vector<16x14xf32>, vector<14x1xf32>, vector<16x1xf32> -> vector<16x1xf32>
    %80 = vector.broadcast %79 : vector<16x1xf32> to vector<16x14xf32>
    %81 = arith.mulf %53, %80 : vector<16x14xf32>
    %82 = vector.extract_strided_slice %69 {offsets = [1, 0], sizes = [1, 14], strides = [1, 1]} : vector<2x14xf32> to vector<1x14xf32>
    %83 = vector.broadcast %82 : vector<1x14xf32> to vector<16x14xf32>
    %84 = arith.addf %81, %83 : vector<16x14xf32>
    %85 = arith.addf %84, %77 : vector<16x14xf32>
    %c0_48 = arith.constant 0 : index
    %c0_49 = arith.constant 0 : index
    %86 = vector.load %arg18[%c0_48, %c0_49] : memref<14x1xf32, #tpu.memory_space<vmem>>, vector<14x1xf32>
    %cst_50 = arith.constant dense<0.000000e+00> : vector<16x1xf32>
    %87 = tpu.matmul %85, %86, %cst_50 {dimension_numbers = #tpu.dot_dimension_numbers<[1], [0], [0], [1], [0, 0, 1, 1], [], []>} : vector<16x14xf32>, vector<14x1xf32>, vector<16x1xf32> -> vector<16x1xf32>
    %88 = arith.addf %21, %87 : vector<16x1xf32>
    %c0_51 = arith.constant 0 : index
    %c0_52 = arith.constant 0 : index
    %89 = vector.load %arg19[%c0_51, %c0_52] : memref<16x1xf32, #tpu.memory_space<vmem>>, vector<16x1xf32>
    %cst_53 = arith.constant dense<0.000000e+00> : vector<16x1xf32>
    %90 = tpu.matmul %67, %89, %cst_53 {dimension_numbers = #tpu.dot_dimension_numbers<[1], [0], [0], [1], [0, 0, 1, 1], [], []>} : vector<16x16xf32>, vector<16x1xf32>, vector<16x1xf32> -> vector<16x1xf32>
    %91 = arith.addf %88, %90 : vector<16x1xf32>
    %92 = arith.negf %91 : vector<16x1xf32>
    %93 = math.exp %92 : vector<16x1xf32>
    %cst_54 = arith.constant 1.000000e+00 : f32
    %94 = vector.broadcast %cst_54 : f32 to vector<16x1xf32>
    %95 = arith.addf %94, %93 : vector<16x1xf32>
    %96 = arith.divf %94, %95 : vector<16x1xf32>
    %c0_55 = arith.constant 0 : index
    %c0_56 = arith.constant 0 : index
    %97 = vector.load %arg20[%c0_55, %c0_56] : memref<16x1xf32, #tpu.memory_space<vmem>>, vector<16x1xf32>
    tpu.vector_store %arg20[%c0_55, %c0_56], %96 {strides = array<i32>} : memref<16x1xf32, #tpu.memory_space<vmem>>, vector<16x1xf32>,
    return
  }
  func.func @transform_0(%arg0: i32) -> (i32, i32) {
    %c0_i32 = arith.constant 0 : i32
    %c0_i32_0 = arith.constant 0 : i32
    return %arg0, %c0_i32 : i32, i32
  }
  func.func @transform_1(%arg0: i32) -> (i32, i32) {
    %c0_i32 = arith.constant 0 : i32
    %c0_i32_0 = arith.constant 0 : i32
    %c0_i32_1 = arith.constant 0 : i32
    return %c0_i32, %c0_i32_0 : i32, i32
  }
  func.func @transform_2(%arg0: i32) -> (i32, i32) {
    %c0_i32 = arith.constant 0 : i32
    %c0_i32_0 = arith.constant 0 : i32
    %c0_i32_1 = arith.constant 0 : i32
    return %c0_i32, %c0_i32_0 : i32, i32
  }
  func.func @transform_3(%arg0: i32) -> (i32, i32) {
    %c0_i32 = arith.constant 0 : i32
    %c0_i32_0 = arith.constant 0 : i32
    %c0_i32_1 = arith.constant 0 : i32
    return %c0_i32, %c0_i32_0 : i32, i32
  }
  func.func @transform_4(%arg0: i32) -> (i32, i32) {
    %c0_i32 = arith.constant 0 : i32
    %c0_i32_0 = arith.constant 0 : i32
    %c0_i32_1 = arith.constant 0 : i32
    return %c0_i32, %c0_i32_0 : i32, i32
  }
  func.func @transform_5(%arg0: i32) -> (i32, i32) {
    %c0_i32 = arith.constant 0 : i32
    %c0_i32_0 = arith.constant 0 : i32
    %c0_i32_1 = arith.constant 0 : i32
    return %c0_i32, %c0_i32_0 : i32, i32
  }
  func.func @transform_6(%arg0: i32) -> (i32, i32) {
    %c0_i32 = arith.constant 0 : i32
    %c0_i32_0 = arith.constant 0 : i32
    %c0_i32_1 = arith.constant 0 : i32
    return %c0_i32, %c0_i32_0 : i32, i32
  }
  func.func @transform_7(%arg0: i32) -> (i32, i32) {
    %c0_i32 = arith.constant 0 : i32
    %c0_i32_0 = arith.constant 0 : i32
    %c0_i32_1 = arith.constant 0 : i32
    return %c0_i32, %c0_i32_0 : i32, i32
  }
  func.func @transform_8(%arg0: i32) -> (i32, i32) {
    %c0_i32 = arith.constant 0 : i32
    %c0_i32_0 = arith.constant 0 : i32
    %c0_i32_1 = arith.constant 0 : i32
    return %c0_i32, %c0_i32_0 : i32, i32
  }
  func.func @transform_9(%arg0: i32) -> (i32, i32) {
    %c0_i32 = arith.constant 0 : i32
    %c0_i32_0 = arith.constant 0 : i32
    %c0_i32_1 = arith.constant 0 : i32
    return %c0_i32, %c0_i32_0 : i32, i32
  }
  func.func @transform_10(%arg0: i32) -> (i32, i32) {
    %c0_i32 = arith.constant 0 : i32
    %c0_i32_0 = arith.constant 0 : i32
    %c0_i32_1 = arith.constant 0 : i32
    return %c0_i32, %c0_i32_0 : i32, i32
  }
  func.func @transform_11(%arg0: i32) -> (i32, i32) {
    %c0_i32 = arith.constant 0 : i32
    %c0_i32_0 = arith.constant 0 : i32
    %c0_i32_1 = arith.constant 0 : i32
    return %c0_i32, %c0_i32_0 : i32, i32
  }
  func.func @transform_12(%arg0: i32) -> (i32, i32) {
    %c0_i32 = arith.constant 0 : i32
    %c0_i32_0 = arith.constant 0 : i32
    %c0_i32_1 = arith.constant 0 : i32
    return %c0_i32, %c0_i32_0 : i32, i32
  }
  func.func @transform_13(%arg0: i32) -> (i32, i32) {
    %c0_i32 = arith.constant 0 : i32
    %c0_i32_0 = arith.constant 0 : i32
    %c0_i32_1 = arith.constant 0 : i32
    return %c0_i32, %c0_i32_0 : i32, i32
  }
  func.func @transform_14(%arg0: i32) -> (i32, i32) {
    %c0_i32 = arith.constant 0 : i32
    %c0_i32_0 = arith.constant 0 : i32
    %c0_i32_1 = arith.constant 0 : i32
    return %c0_i32, %c0_i32_0 : i32, i32
  }
  func.func @transform_15(%arg0: i32) -> (i32, i32) {
    %c0_i32 = arith.constant 0 : i32
    %c0_i32_0 = arith.constant 0 : i32
    %c0_i32_1 = arith.constant 0 : i32
    return %c0_i32, %c0_i32_0 : i32, i32
  }
  func.func @transform_16(%arg0: i32) -> (i32, i32) {
    %c0_i32 = arith.constant 0 : i32
    %c0_i32_0 = arith.constant 0 : i32
    %c0_i32_1 = arith.constant 0 : i32
    return %c0_i32, %c0_i32_0 : i32, i32
  }
  func.func @transform_17(%arg0: i32) -> (i32, i32) {
    %c0_i32 = arith.constant 0 : i32
    %c0_i32_0 = arith.constant 0 : i32
    %c0_i32_1 = arith.constant 0 : i32
    return %c0_i32, %c0_i32_0 : i32, i32
  }
  func.func @transform_18(%arg0: i32) -> (i32, i32) {
    %c0_i32 = arith.constant 0 : i32
    %c0_i32_0 = arith.constant 0 : i32
    %c0_i32_1 = arith.constant 0 : i32
    return %c0_i32, %c0_i32_0 : i32, i32
  }
  func.func @transform_19(%arg0: i32) -> (i32, i32) {
    %c0_i32 = arith.constant 0 : i32
    %c0_i32_0 = arith.constant 0 : i32
    return %arg0, %c0_i32 : i32, i32
  }
}

</mosaic_0001>

<bundles_post_ra>
// kernel: tpu_custom_call.1
= control target key start
LH: loop header
LB: loop body
LE: loop exit
PB: predicated region body
PF: predicated region fallthrough
CT: control target
= control target key end

     0   :  { %s1463_s20 = smov 0   ;;  %s1642_s0 = inlined_call_operand.vmem [shape: f32[32,5], index: 0, kind: input, shape index: {}]   ;;  %s1643_s1 = inlined_call_operand.vmem [shape: f32[5,32], index: 1, kind: input, shape index: {}]   ;;  %s1644_s2 = inlined_call_operand.vmem [shape: f32[1,32], index: 2, kind: input, shape index: {}]   ;;  %s1645_s3 = inlined_call_operand.vmem [shape: f32[32,16], index: 3, kind: input, shape index: {}]   ;;  %s1646_s4 = inlined_call_operand.vmem [shape: f32[1,16], index: 4, kind: input, shape index: {}]   ;;  %s1647_s5 = inlined_call_operand.vmem [shape: f32[16,1], index: 5, kind: input, shape index: {}]   ;;  %s1648_s6 = inlined_call_operand.<no memory space> [shape: f32[1,1], index: 6, kind: input, shape index: {}]   ;;  %s1649_s7 = inlined_call_operand.vmem [shape: f32[14,32], index: 7, kind: input, shape index: {}]   ;;  %s1650_s8 = inlined_call_operand.vmem [shape: f32[1,32], index: 8, kind: input, shape index: {}]   ;;  %s1651_s9 = inlined_call_operand.vmem [shape: f32[32,16], index: 9, kind: input, shape index: {}]   ;;  %s1652_s10 = inlined_call_operand.vmem [shape: f32[1,16], index: 10, kind: input, shape index: {}]   ;;  %s1653_s11 = inlined_call_operand.vmem [shape: f32[5,14], index: 11, kind: input, shape index: {}]   ;;  %s1654_s12 = inlined_call_operand.vmem [shape: f32[10,14], index: 12, kind: input, shape index: {}]   ;;  %s1655_s13 = inlined_call_operand.vmem [shape: f32[12,14], index: 13, kind: input, shape index: {}]   ;;  %s1656_s14 = inlined_call_operand.vmem [shape: f32[8,14], index: 14, kind: input, shape index: {}]   ;;  %s1657_s15 = inlined_call_operand.vmem [shape: f32[14,2], index: 15, kind: input, shape index: {}]   ;;  %s1658_s16 = inlined_call_operand.vmem [shape: f32[2,14], index: 16, kind: input, shape index: {}]   ;;  %s1659_s17 = inlined_call_operand.vmem [shape: f32[14,1], index: 17, kind: input, shape index: {}]   ;;  %s1660_s18 = inlined_call_operand.vmem [shape: f32[16,1], index: 18, kind: input, shape index: {}]   ;;  %s1661_s19 = inlined_call_operand.vmem [shape: f32[32,1], index: 19, kind: output, shape index: {}]  }
   0x1   :  { %1663 = sst [smem:[#allocation3_spill]] %s1642_s0  ;;  %v24_v0 = vstv %s1648_s6 }
   0x2   :  { %1664 = sst [smem:[#allocation4_spill]] %s1643_s1  ;;  %25 = vst [vmem:[#allocation2] sm:$0x1] %v24_v0 }
   0x3   :  { %1665 = sst [smem:[#allocation5_spill]] %s1644_s2 }
   0x4   :  { %1666 = sst [smem:[#allocation6_spill]] %s1645_s3 }
   0x5 LB: > { %s1250_s21 = sadd.s32 4294967295, %s1353_s20   ;;  %p1254_p0 = scmp.ge.s32.totalorder %s1353_s20, 1  ;;  %s1353_s20 = sphi %s1463_s20, %s31_s20  }
   0x6   : > { %p540_p1 = scmp.lt.s32.totalorder %s1353_s20, 3 }
   0x8   : > { %p541_p2 = pnand %p1254_p0, %p540_p1 }
   0x9   : > { %s1667_s2 = sld [smem:[#allocation4_spill]] (!%p541_p2)  ;;  %s1255_s6 = sshll.u32 (!%p541_p2), %s1250_s21, 1 }
   0xa   : > { %544 = sbr.rel (%p541_p2) target bundleno = 1104 (0x450), region = 96  ;;  %s1668_s25 = sld [smem:[#allocation6_spill]] (!%p541_p2) }
   0xb   : > { %p597_p3 = scmp.lt.s32.totalorder (!%p541_p2), %s1255_s6, 3  ;;  %s1669_s28 = sld [smem:[#allocation3_spill]] (!%p541_p2) }
   0xf   : > { %v610_v1 = vld [vmem:[%s1667_s2] sm:$0x1f]  ;;  %vm622_vm0 = vcmask 1044480   ;;  %s1672_s6 = smov (!%p597_p3, %s1255_s6), 3  ;;  %vm615_vm1 = vcmask 39936   ;;  %v1355_v11 = vmov 0   ;;  %v732_v29 = vlaneseq }
  0x10   : > { %v654_v2 = vld [vmem:[%s1668_s25 + $0x18] sm:$0xff]  ;;  %1259 = vmatpush.msk.msra.mxu0 %vm622_vm0, %v610_v1  ;;  %1303 = vmatpush.msk.msra.mxu2 %vm622_vm0, %v610_v1  ;;  %s1256_s3 = sshll.u32 %s1672_s6, 3  ;;  %v653_v5 = vld [vmem:[%s1668_s25 + $0x10] sm:$0xff]  ;;  %v652_v6 = vld [vmem:[%s1668_s25 + $0x8] sm:$0xff]  ;;  %v1356_v16 = vmov 1   ;;  %vm755_vm4 = vcmask 1041408  }
  0x11   : > { %678 = vmatpush.msra.mxu1 %v654_v2  ;;  %s600_s29 = scalar_lea.vmem %s1669_s28, %s1256_s3  ;;  %v651_v7 = vld [vmem:[%s1668_s25] sm:$0xff]  ;;  %1327 = vset.pattern.permute.xlu0 %v1355_v11  ;;  %v747_v15 = vld [vmem:[%s1654_s12 + $0x8] sm:$0x3]  ;;  %v1357_v19 = vmov 2   ;;  %s1670_s28 = sld [smem:[#allocation5_spill]]  ;;  %vm659_vm5 = vcmask 261120  }
  0x12   : > { %v1487_v3 = vld [vmem:[%s600_s29] sm:$0xff]  ;;  %v1489_v4 = vld [vmem:[%s600_s29 + $0x8] sm:$0xff]  ;;  %1328 = vset.pattern.permute.xlu1 %v1356_v16  ;;  %1330 = vset.pattern.permute.xlu2 %v1356_v16  ;;  %v733_v30 = vand.u32 127, %v732_v29  ;;  %vm748_vm6 = vcmask 80896   ;;  %v1358_v32 = vmov 0.0   ;;  %vm829_vm9 = vcmask 1043456   ;;  %s606_s0 = scalar_lea.vmem %s1661_s19, %s1256_s3 }
  0x13   : > { %1260 = vmatmul.msk.f32.vlgmr.msra.gmra.mxu0 %vm615_vm1, %v1487_v3  ;;  %1261 = vmatmul.msk.f32.vlgmr.msra.gmra.mxu2 %vm615_vm1, %v1489_v4  ;;  %v1305_v8 = vceil.f32 %v1487_v3  ;;  %v1306_v9 = vfloor.f32 %v1487_v3  ;;  %vm1304_vm2 = vcmp.lt.s32.totalorder %v1487_v3, 0  ;;  %vm1309_vm3 = vcmp.lt.s32.totalorder %v1489_v4, 0  ;;  %v692_v27 = vld [vmem:[%s1647_s5 + $0x8] sm:$0xff]  ;;  %v746_v28 = vld [vmem:[%s1654_s12] sm:$0xff]  ;;  %s1359_s2 = smov 127   ;;  %v948_v61 = vld [vmem:[%s1651_s9 + $0x18] sm:$0xff] }
  0x14   : > { %679 = vmatpush.msra.mxu1 %v653_v5  ;;  %v1310_v13 = vceil.f32 %v1489_v4  ;;  %v1311_v14 = vfloor.f32 %v1489_v4  ;;  %1268 = vmatpush.msk.msra.mxu3 %vm755_vm4, %v747_v15  ;;  %v691_v34 = vld [vmem:[%s1647_s5] sm:$0xff]  ;;  %v821_v37 = vld [vmem:[%s1655_s13 + $0x8] sm:$0xf]  ;;  %vm871_vm11 = vcmask 64512   ;;  %vm697_vm13 = vcmask 130048  }
  0x15   : > { %v1307_v10 = vsel %vm1304_vm2, %v1305_v8, %v1306_v9  ;;  %718 = vmatpush.msrb.mxu2 %v692_v27  ;;  %v729_v35 = vld [vmem:[%s1653_s11] sm:$0x1f]  ;;  %vm822_vm15 = vcmask 97280   ;;  %v985_v56 = vld [vmem:[%s1657_s15 + $0x8] sm:$0x3f]  ;;  %vm909_vm2 = vcmask 113664  }
  0x16   : > { %680 = vmatpush.msra.mxu1 %v652_v6  ;;  %v1308_v12 = vcvt.f32.s32 %v1307_v10  ;;  %v1312_v17 = vsel %vm1309_vm3, %v1310_v13, %v1311_v14  ;;  %774 = vmatpush.msra.mxu3 %v746_v28  ;;  %v870_v38 = vld [vmem:[%s1656_s14] sm:$0xff]  ;;  %v904_v58 = vld [vmem:[%s1649_s7 + $0x8] sm:$0x3f]  ;;  %v947_v13 = vld [vmem:[%s1651_s9 + $0x10] sm:$0xff] }
  0x17   : > { %v1313_v18 = vcvt.f32.s32 %v1312_v17  ;;  %v1334_v20 = vld [vmem:[%s1670_s28] ss:$0 sm:$0xff]  ;;  %719 = vmatpush.msrb.mxu2 %v691_v34  ;;  %1271 = vmatpush.msk.msrb.mxu0 %vm622_vm0, %v729_v35  ;;  %v946_v14 = vld [vmem:[%s1651_s9 + $0x8] sm:$0xff] }
  0x18   : > { %681 = vmatpush.msra.mxu1 %v651_v7  ;;  %735 = vperm.xlu0 %1327, %v1308_v12   ;;  %v820_v41 = vld [vmem:[%s1655_s13] sm:$0xff]  ;;  %v1121_v27 = vld [vmem:[%s1660_s18 + $0x8] sm:$0xff] }
  0x19   : > { %809 = vperm.xlu1 %1328, %v1308_v12   ;;  %812 = vperm.xlu2 %1330, %v1313_v18   ;;  %v1335_v47 = vld [vmem:[%s1646_s4] ss:$0 sm:$0xff] }
  0x1a   : > { %1276 = vmatpush.msk.msra.mxu2 %vm829_vm9, %v821_v37  ;;  %893 = vmatpush.msrb.mxu3 %v870_v38  ;;  %v984_v57 = vld [vmem:[%s1657_s15] sm:$0xff] }
  0x1b   : > { %1272 = vmatmul.msk.f32.vlgmr.msrb.gmra.mxu0 %vm615_vm1, %v1487_v3  ;;  %v903_v59 = vld [vmem:[%s1649_s7] sm:$0xff] }
  0x1c   : > { %848 = vmatpush.msra.mxu2 %v820_v41  ;;  %971 = vmatpush.msra.mxu0 %v948_v61  ;;  %v945_v15 = vld [vmem:[%s1651_s9] sm:$0xff] }
  0x1d   : > { %v1120_v28 = vld [vmem:[%s1660_s18] sm:$0xff] }
  0x1e   : > { %972 = vmatpush.msra.mxu0 %v947_v13  ;;  %v986_v29 = vld [vmem:[%s1658_s16] sm:$0x3] }
  0x1f   : > { %v1338_v35 = vld [vmem:[%s1652_s10] ss:$0 sm:$0xff] }
  0x20   : > { %738 = vperm.xlu0 %1327, %v1313_v18   ;;  %973 = vmatpush.msra.mxu0 %v946_v14 }
  0x21   : > { %1329 = vset.pattern.permute.xlu1 %v1357_v19  ;;  %1331 = vset.pattern.permute.xlu2 %v1357_v19 }
  0x22   : > { %859 = vperm.xlu1 %1329, %v1308_v12   ;;  %862 = vperm.xlu2 %1331, %v1313_v18   ;;  %v1337_v18 = vld [vmem:[%s1650_s8] ss:$0 sm:$0xff] }
  0x23   : > { %1273 = vmatmul.msk.f32.gmra.mxu0 %vm615_vm1, %v1489_v4  ;;  %vm916_vm1 = vcmask 1045504  }
  0x24   : > { %1283 = vmatpush.msk.msrb.mxu1 %vm916_vm1, %v904_v58  ;;  %974 = vmatpush.msra.mxu0 %v945_v15 }
  0x26   : > { %935 = vmatpush.msrb.mxu1 %v903_v59  ;;  %1142 = vmatpush.msrb.mxu0 %v1121_v27  ;;  %v1336_v59 = vld [vmem:[#allocation2] ss:$0 sm:$0xff] }
  0x28   : > { %1143 = vmatpush.msrb.mxu0 %v1120_v28 }
  0x2a   : > { %1332 = vset.pattern.permute.xlu1 %v1355_v11  ;;  %1333 = vset.pattern.permute.xlu2 %v1355_v11 }
  0x2b   : > { %1033 = vrot.lane.b32.xlu1 %v985_v56, %s1359_s2  ;;  %1031 = vrot.lane.b32.xlu2 %v984_v57, %s1359_s2 }
  0x73   : > { %v813_v42 = vpop.permute.xlu2 %812 }
  0x74   : > { %vm815_vm0 = vcmp.eq.s32.totalorder %v733_v30, %v813_v42 }
  0x75   : > { %v1275_v55 = vsel %vm815_vm0, 1.0, %v1358_v32 }
  0x7c   : > { %v863_v45 = vpop.permute.xlu2 %862 }
  0x7d   : > { %vm865_vm12 = vcmp.eq.s32.totalorder %v733_v30, %v863_v45 }
  0x7e   : > { %v1280_v46 = vsel %vm865_vm12, 1.0, %v1358_v32 }
  0x85   : > { %v1032_v17 = vpop.permute.xlu2 %1031 }
  0x8a   : > { %v736_v31 = vpop.permute.xlu0 %735 }
  0x8b   : > { %vm740_vm7 = vcmp.eq.s32.totalorder %v733_v30, %v736_v31  ;;  %v810_v40 = vpop.permute.xlu1 %809 }
  0x8c   : > { %v1266_v33 = vsel %vm740_vm7, 1.0, %v1358_v32  ;;  %vm814_vm14 = vcmp.eq.s32.totalorder %v733_v30, %v810_v40 }
  0x8d   : > { %1269 = vmatmul.msk.f32.vlgmr.msra.gmra.mxu3 %vm748_vm6, %v1266_v33  ;;  %v1274_v54 = vsel %vm814_vm14, 1.0, %v1358_v32 }
  0x90   : > { %v643_v21 = vpop.f32.mrf.mxu0 }
  0x91   : > { %v644_v22 = vadd.f32 %v1334_v20, %v643_v21 }
  0x92   : > { %v739_v36 = vpop.permute.xlu0 %738 }
  0x93   : > { %v649_v23 = vmax.f32 %v644_v22, 0.0  ;;  %vm741_vm8 = vcmp.eq.s32.totalorder %v733_v30, %v739_v36 }
  0x94   : > { %v1267_v39 = vsel %vm741_vm8, 1.0, %v1358_v32  ;;  %v860_v43 = vpop.permute.xlu1 %859 }
  0x95   : > { %1262 = vmatmul.msk.f32.vlgmr.msra.gmra.mxu1 %vm659_vm5, %v649_v23  ;;  %1270 = vmatmul.msk.f32.gmra.mxu3 %vm748_vm6, %v1267_v39  ;;  %vm864_vm10 = vcmp.eq.s32.totalorder %v733_v30, %v860_v43  ;;  %v1025_v30 = vperm.slane %v986_v29, 0  ;;  %vm1191_vm6 = vcmask 7168  }
  0x96   : > { %v646_v24 = vpop.f32.mrf.mxu2  ;;  %v1279_v44 = vsel %vm864_vm10, 1.0, %v1358_v32 }
  0x97   : > { %v647_v25 = vadd.f32 %v1334_v20, %v646_v24 }
  0x98   : > { %v802_v1 = vpop.f32.mrf.mxu0 }
  0x99   : > { %v650_v26 = vmax.f32 %v647_v25, 0.0 }
  0x9d   : > { %1263 = vmatmul.msk.f32.gmra.mxu1 %vm659_vm5, %v650_v26  ;;  %1281 = vmatmul.msk.f32.vlgmr.msrb.gmra.mxu3 %vm871_vm11, %v1279_v44  ;;  %v1034_v16 = vpop.permute.xlu1 %1033 }
  0x9e   : > { %1291 = vmatpush.msk.msra.mxu3 %vm916_vm1, %v1034_v16 }
  0xa0   : > { %v805_v7 = vpop.f32.mrf.mxu0  ;;  %1059 = vmatpush.msra.mxu3 %v1032_v17 }
  0xa5   : > { %1282 = vmatmul.msk.f32.gmra.mxu3 %vm871_vm11, %v1280_v46 }
 0x110   : > { %v776_v60 = vpop.f32.mrf.mxu3 }
 0x111   : > { %v803_v3 = vadd.f32 %v802_v1, %v776_v60 }
 0x112   : > { %v683_v48 = vpop.f32.mrf.mxu1 }
 0x113   : > { %v684_v49 = vadd.f32 %v1335_v47, %v683_v48  ;;  %v1085_v48 = vld [vmem:[%s1659_s17 + $0x8] sm:$0x3f] }
 0x114   : > { %1294 = vmatpush.msk.msra.mxu1 %vm916_vm1, %v1085_v48 }
 0x115   : > { %v689_v50 = vmax.f32 %v684_v49, 0.0  ;;  %v1084_v49 = vld [vmem:[%s1659_s17] sm:$0xff] }
 0x116   : > { %1110 = vmatpush.msra.mxu1 %v1084_v49 }
 0x117   : > { %1264 = vmatmul.msk.f32.vlgmr.msrb.gmra.mxu2 %vm697_vm13, %v689_v50 }
 0x118   : > { %1288 = vmatpush.msk.msrb.mxu2 %vm916_vm1, %v985_v56  ;;  %v779_v63 = vpop.f32.mrf.mxu3 }
 0x119   : > { %v806_v8 = vadd.f32 %v805_v7, %v779_v63 }
 0x11a   : > { %v686_v51 = vpop.f32.mrf.mxu1  ;;  %1005 = vmatpush.msrb.mxu2 %v984_v57 }
 0x11b   : > { %v687_v52 = vadd.f32 %v1335_v47, %v686_v51  ;;  %v1079_v51 = vperm.slane %v986_v29, 1 }
 0x11d   : > { %v690_v53 = vmax.f32 %v687_v52, 0.0 }
 0x11f   : > { %1265 = vmatmul.msk.f32.gmra.mxu2 %vm697_vm13, %v690_v53 }
 0x120   : > { %v895_v2 = vpop.f32.mrf.mxu3 }
 0x127   : > { %1277 = vmatmul.msk.f32.vlgmr.msra.gmra.mxu2 %vm822_vm15, %v1274_v54 }
 0x128   : > { %v898_v10 = vpop.f32.mrf.mxu3 }
 0x12f   : > { %1278 = vmatmul.msk.f32.gmra.mxu2 %vm822_vm15, %v1275_v55 }
 0x19a   : > { %v1568_v62 = vpop.f32.mrf.mxu2 }
 0x19b   : > { %v722_v60 = vadd.f32 %v1336_v59, %v1568_v62 }
 0x19d   : > { %v727_v61 = vmax.f32 %v722_v60, 0.0 }
 0x1a2   : > { %v1570_v0 = vpop.f32.mrf.mxu2 }
 0x1aa   : > { %v850_v4 = vpop.f32.mrf.mxu2 }
 0x1ab   : > { %v856_v5 = vadd.f32 %v850_v4, %v803_v3  ;;  %v725_v3 = vadd.f32 %v1336_v59, %v1570_v0 }
 0x1ad   : > { %v1572_v6 = vadd.f32 %v895_v2, %v856_v5 }
 0x1af   : > { %1284 = vmatmul.msk.f32.vlgmr.msrb.gmra.mxu1 %vm909_vm2, %v1572_v6  ;;  %1289 = vmatmul.msk.f32.vlgmr.msrb.gmra.mxu2 %vm909_vm2, %v1572_v6 }
 0x1b2   : > { %v853_v9 = vpop.f32.mrf.mxu2 }
 0x1b3   : > { %v857_v11 = vadd.f32 %v853_v9, %v806_v8 }
 0x1b5   : > { %v1578_v12 = vadd.f32 %v898_v10, %v857_v11 }
 0x1b7   : > { %1285 = vmatmul.msk.f32.gmra.mxu1 %vm909_vm2, %v1578_v12  ;;  %1290 = vmatmul.msk.f32.gmra.mxu2 %vm909_vm2, %v1578_v12 }
 0x22c   : > { %v937_v19 = vpop.f32.mrf.mxu1 }
 0x22d   : > { %v938_v20 = vadd.f32 %v1337_v18, %v937_v19 }
 0x22f   : > { %v943_v21 = vmax.f32 %v938_v20, 0.0 }
 0x231   : > { %1286 = vmatmul.msk.f32.vlgmr.msra.gmra.mxu0 %vm659_vm5, %v943_v21 }
 0x232   : > { %v1007_v22 = vpop.f32.mrf.mxu2 }
 0x233   : > { %1015 = vperm.xlu0 %1327, %v1007_v22  }
 0x234   : > { %v940_v23 = vpop.f32.mrf.mxu1 }
 0x235   : > { %v941_v24 = vadd.f32 %v1337_v18, %v940_v23 }
 0x237   : > { %v944_v25 = vmax.f32 %v941_v24, 0.0 }
 0x239   : > { %1287 = vmatmul.msk.f32.gmra.mxu0 %vm659_vm5, %v944_v25 }
 0x23a   : > { %v1010_v26 = vpop.f32.mrf.mxu2 }
 0x23b   : > { %1020 = vperm.xlu0 %1327, %v1010_v26  }
 0x2a5   : > { %v1016_v31 = vpop.permute.xlu0 %1015 }
 0x2a6   : > { %v1023_v32 = vmul.f32 %v1016_v31, %v1572_v6 }
 0x2a8   : > { %v1026_v33 = vadd.f32 %v1025_v30, %v1023_v32 }
 0x2aa   : > { %v1028_v34 = vadd.f32 %v1026_v33, %v1572_v6 }
 0x2ac   : > { %1292 = vmatmul.msk.f32.vlgmr.msra.gmra.mxu3 %vm909_vm2, %v1028_v34 }
 0x2ad   : > { %v1021_v36 = vpop.permute.xlu0 %1020 }
 0x2ae   : > { %v1024_v37 = vmul.f32 %v1021_v36, %v1578_v12  ;;  %v976_v38 = vpop.f32.mrf.mxu0 }
 0x2af   : > { %v977_v39 = vadd.f32 %v1338_v35, %v976_v38 }
 0x2b0   : > { %v1027_v40 = vadd.f32 %v1025_v30, %v1024_v37 }
 0x2b1   : > { %v982_v41 = vmax.f32 %v977_v39, 0.0 }
 0x2b2   : > { %v1029_v42 = vadd.f32 %v1027_v40, %v1578_v12 }
 0x2b3   : > { %1297 = vmatmul.msk.f32.vlgmr.msrb.gmra.mxu0 %vm697_vm13, %v982_v41 }
 0x2b4   : > { %1293 = vmatmul.msk.f32.gmra.mxu3 %vm909_vm2, %v1029_v42 }
 0x2b6   : > { %v979_v43 = vpop.f32.mrf.mxu0 }
 0x2b7   : > { %v980_v44 = vadd.f32 %v1338_v35, %v979_v43 }
 0x2b9   : > { %v983_v45 = vmax.f32 %v980_v44, 0.0 }
 0x2bb   : > { %1298 = vmatmul.msk.f32.gmra.mxu0 %vm697_vm13, %v983_v45 }
 0x32f   : > { %v1061_v46 = vpop.f32.mrf.mxu3 }
 0x330   : > { %1069 = vperm.xlu1 %1332, %v1061_v46   ;;  %v1145_v63 = vpop.f32.mrf.mxu0 }
 0x337   : > { %v1064_v47 = vpop.f32.mrf.mxu3 }
 0x338   : > { %1074 = vperm.xlu2 %1333, %v1064_v47   ;;  %v1148_v9 = vpop.f32.mrf.mxu0 }
 0x392   : > { %v1075_v53 = vpop.permute.xlu2 %1074 }
 0x393   : > { %v1078_v55 = vmul.f32 %v1075_v53, %v1578_v12 }
 0x395   : > { %v1081_v57 = vadd.f32 %v1079_v51, %v1078_v55 }
 0x397   : > { %v1083_v58 = vadd.f32 %v1081_v57, %v1029_v42 }
 0x3a2   : > { %v1070_v50 = vpop.permute.xlu1 %1069 }
 0x3a3   : > { %v1077_v52 = vmul.f32 %v1070_v50, %v1572_v6  ;;  %v728_v6 = vmax.f32 %v725_v3, 0.0 }
 0x3a5   : > { %v1080_v54 = vadd.f32 %v1079_v51, %v1077_v52 }
 0x3a7   : > { %v1082_v56 = vadd.f32 %v1080_v54, %v1028_v34 }
 0x3a9   : > { %1295 = vmatmul.msk.f32.vlgmr.msra.gmra.mxu1 %vm909_vm2, %v1082_v56 }
 0x3b1   : > { %1296 = vmatmul.msk.f32.gmra.mxu1 %vm909_vm2, %v1083_v58 }
 0x426   : > { %v1112_v1 = vpop.f32.mrf.mxu1 }
 0x427   : > { %v1118_v2 = vadd.f32 %v1112_v1, %v727_v61 }
 0x429   : > { %v1151_v4 = vadd.f32 %v1145_v63, %v1118_v2 }
 0x42b   : > { %v1299_v5 = vmul.f32 -1.442695, %v1151_v4 }
 0x42d   : > { %1339 = vpow2.f32 %v1299_v5 }
 0x42e   : > { %v1115_v7 = vpop.f32.mrf.mxu1 }
 0x42f   : > { %v1119_v8 = vadd.f32 %v1115_v7, %v728_v6 }
 0x431   : > { %v1152_v10 = vadd.f32 %v1148_v9, %v1119_v8 }
 0x433   : > { %v1340_v11 = vpop.eup %1339  ;;  %v1300_v12 = vmul.f32 -1.442695, %v1152_v10 }
 0x434   : > { %v1159_v13 = vadd.f32 1.0, %v1340_v11 }
 0x435   : > { %1341 = vpow2.f32 %v1300_v12 }
 0x436   : > { %1343 = vrcp.f32 %v1159_v13  ;;  %v1172_v17 = vand.u32 2147483648, %v1159_v13  ;;  %v1170_v19 = vand.u32 2147483647, %v1159_v13  ;;  %vm1166_vm4 = vweird.f32 %v1159_v13 }
 0x438   : > { %v1173_v22 = vor.u32 1.1754944e-38, %v1172_v17  ;;  %vm1171_vm7 = vcmp.eq.f32.partialorder %v1170_v19, 8.507059e+37 }
 0x43b   : > { %v1342_v62 = vpop.eup %1341 }
 0x43c   : > { %v1344_v14 = vpop.eup %1343  ;;  %v1160_v15 = vadd.f32 1.0, %v1342_v62 }
 0x43d   : > { %v1162_v16 = vmul.f32 %v1344_v14, %v1159_v13  ;;  %vm1167_vm3 = vweird.f32 %v1344_v14 }
 0x43e   : > { %1345 = vrcp.f32 %v1160_v15  ;;  %vm1168_vm5 = vmor %vm1166_vm4, %vm1167_vm3  ;;  %v1187_v27 = vand.u32 2147483648, %v1160_v15  ;;  %v1185_v29 = vand.u32 2147483647, %v1160_v15  ;;  %vm1181_vm9 = vweird.f32 %v1160_v15 }
 0x43f   : > { %v1163_v0 = vsub.f32 1.0, %v1162_v16 }
 0x440   : > { %v1188_v31 = vor.u32 1.1754944e-38, %v1187_v27  ;;  %vm1186_vm11 = vcmp.eq.f32.partialorder %v1185_v29, 8.507059e+37 }
 0x441   : > { %v1164_v18 = vmul.f32 %v1344_v14, %v1163_v0 }
 0x443   : > { %v1165_v20 = vadd.f32 %v1344_v14, %v1164_v18 }
 0x444   : > { %v1346_v21 = vpop.eup %1345 }
 0x445   : > { %v1169_v23 = vsel %vm1168_vm5, %v1344_v14, %v1165_v20  ;;  %v1177_v24 = vmul.f32 %v1346_v21, %v1160_v15  ;;  %vm1182_vm8 = vweird.f32 %v1346_v21 }
 0x446   : > { %v1174_v25 = vsel %vm1171_vm7, %v1173_v22, %v1169_v23  ;;  %vm1183_vm10 = vmor %vm1181_vm9, %vm1182_vm8 }
 0x447   : > { %1192 = vst.msk [vmem:[%s606_s0] sm:$0xff] %vm1191_vm6, %v1174_v25  ;;  %v1178_v26 = vsub.f32 1.0, %v1177_v24 }
 0x449   : > { %v1179_v28 = vmul.f32 %v1346_v21, %v1178_v26 }
 0x44b   : > { %v1180_v30 = vadd.f32 %v1346_v21, %v1179_v28 }
 0x44d   : > { %v1184_v32 = vsel %vm1183_vm10, %v1346_v21, %v1180_v30 }
 0x44e   : > { %v1189_v33 = vsel %vm1186_vm11, %v1188_v31, %v1184_v32 }
 0x44f   : > { %1193 = vst.msk [vmem:[%s606_s0 + $0x8] sm:$0xff] %vm1191_vm6, %v1189_v33 }
 0x450 PF: > { %s31_s20 = sadd.s32 1, %s1353_s20  }
 0x451   : > { %p28_p4 = scmp.ge.s32.totalorder %s31_s20, 4  }
 0x453   :  { %30 = sbr.rel (!%p28_p4) target bundleno = 5 (0x5), region = 126 }

</bundles_post_ra>
